<compile_context>
chip_gen: v7x
topology: tpu7x:2x2x1
jax: 0.10.0
libtpu: 0.0.40
codegen_flags: <defaults>
</compile_context>

<pallas_src>
import math
import functools

import jax
import jax.numpy as jnp
from jax import lax
from jax.experimental import pallas as pl
from jax.experimental.pallas import tpu as pltpu


_NEG_FILL = -1e30  # logit fill for padded output columns -> exp() underflows to exactly 0


def _linear_softmax_kernel(x_ref, w_ref, b_ref, o_ref, acc_ref):
    """Grid: (M // tm, K // tk); the K (reduction) axis is last and "arbitrary".

    x_ref:   (tm, tk)    native dtype
    w_ref:   (Npad, tk)  native dtype (PyTorch layout; contraction on dim 1)
    b_ref:   (1, Npad)
    o_ref:   (tm, Npad)
    acc_ref: (tm, Npad)  f32 accumulator scratch (persists across the K axis)
    """
    k = pl.program_id(1)

    @pl.when(k == 0)
    def _():
        acc_ref[...] = jnp.zeros_like(acc_ref)

    # NT matmul straight on the MXU: contract dim 1 of x with dim 1 of W.
    # No in-kernel transpose (no XLU relayout of the weight tile) and no
    # operand up-cast; accumulation is f32 via preferred_element_type.
    acc_ref[...] += lax.dot_general(
        x_ref[...],
        w_ref[...],
        dimension_numbers=(((1,), (1,)), ((), ())),
        preferred_element_type=jnp.float32,
    )

    @pl.when(k == pl.num_programs(1) - 1)
    def _():
        # Bias folded in exactly once, at finalize (padded lanes hold _NEG_FILL).
        logits = acc_ref[...] + b_ref[...].astype(jnp.float32)
        # Numerically-stable softmax over the full (padded) lane axis.
        m = jnp.max(logits, axis=-1, keepdims=True)      # XLU
        e = jnp.exp(logits - m)                          # EUP
        denom = jnp.sum(e, axis=-1, keepdims=True)       # XLU
        # approx=True would push the divide onto the otherwise-idle EUP slot
        # (nice on v5e); exact keeps the tight reference tolerance here.
        probs = e * pl.reciprocal(denom, approx=False)
        o_ref[...] = probs.astype(o_ref.dtype)


def _pick_tile(dim, preferred, align):
    """Largest divisor of `dim` that is a multiple of `align` and <= `preferred`.

    Falls back to the full dim (always a legal block extent) if none exists."""
    cand = min(preferred, dim)
    cand -= cand % align
    while cand >= align:
        if dim % cand == 0:
            return cand
        cand -= align
    return dim


@functools.partial(jax.jit, static_argnames=("tm", "tk", "vmem_limit_bytes"))
def linear_softmax(x, weight, bias, *, tm=None, tk=None,
                   vmem_limit_bytes=48 * 1024 * 1024):
    """softmax(x @ weight.T + bias, axis=-1) via a Pallas TPU kernel.

    x: (..., K), weight: (N, K), bias: (N,)
    """
    orig_shape = x.shape
    K = orig_shape[-1]
    N, K2 = weight.shape
    assert K == K2

    x2 = x.reshape(-1, K)
    M = x2.shape[0]

    # Pad out_features up to a lane-dense multiple of 128: unmasked vst stores,
    # full MXU columns. Padded weight rows are zero and padded bias entries are
    # _NEG_FILL, so padded logits contribute exactly 0 to the softmax.
    n_pad = (-N) % 128
    Npad = N + n_pad
    w_p = jnp.pad(weight, ((0, n_pad), (0, 0))) if n_pad else weight
    b_p = jnp.pad(bias, (0, n_pad), constant_values=_NEG_FILL) if n_pad else bias
    b2d = b_p.reshape(1, Npad)

    # Tile the batch (sublane-aligned, >=2 grid steps for big M so the pipeline
    # and the second v7x TensorCore have work) and the contraction dimension
    # (caps resident VMEM footprint; weight is streamed as (Npad, tk) slabs).
    if tm is None:
        tm = _pick_tile(M, 256, 8)
    if tk is None:
        tk = _pick_tile(K, 512, 128)
    assert M % tm == 0
    assert K % tk == 0

    grid = (M // tm, K // tk)  # reduction axis last

    out = pl.pallas_call(
        _linear_softmax_kernel,
        out_shape=jax.ShapeDtypeStruct((M, Npad), x.dtype),
        grid_spec=pltpu.PrefetchScalarGridSpec(
            num_scalar_prefetch=0,
            grid=grid,
            in_specs=[
                pl.BlockSpec((tm, tk), lambda i, k: (i, k)),    # x tile
                pl.BlockSpec((Npad, tk), lambda i, k: (0, k)),  # weight K-slab (streamed)
                pl.BlockSpec((1, Npad), lambda i, k: (0, 0)),   # bias (resident, tiny)
            ],
            out_specs=pl.BlockSpec((tm, Npad), lambda i, k: (i, 0)),
            scratch_shapes=[pltpu.VMEM((tm, Npad), jnp.float32)],  # f32 logits accumulator
        ),
        compiler_params=pltpu.CompilerParams(
            dimension_semantics=("parallel", "arbitrary"),
            vmem_limit_bytes=vmem_limit_bytes,  # safe on v5e/v6e (128 MiB) and v7x (64 MiB)
        ),
    )(x2, w_p, b2d)

    if n_pad:
        out = out[:, :N]
    return out.reshape(*orig_shape[:-1], N)


def init_linear_params(key, in_features, out_features):
    """Deterministic init mirroring nn.Linear's default (kaiming_uniform a=sqrt(5))."""
    kw, kb = jax.random.split(key)
    # kaiming_uniform with a=sqrt(5) -> bound = 1/sqrt(fan_in)
    w_bound = 1.0 / math.sqrt(in_features)
    weight = jax.random.uniform(
        kw, (out_features, in_features), jnp.float32, minval=-w_bound, maxval=w_bound
    )
    b_bound = 1.0 / math.sqrt(in_features)
    bias = jax.random.uniform(
        kb, (out_features,), jnp.float32, minval=-b_bound, maxval=b_bound
    )
    return weight, bias


if __name__ == "__main__":
    key = jax.random.PRNGKey(0)
    k_x, k_p = jax.random.split(key)

    batch, in_features, out_features = 8, 32, 64

    x = jax.random.normal(k_x, (batch, in_features), dtype=jnp.float32)
    weight, bias = init_linear_params(k_p, in_features, out_features)

    out = linear_softmax(x, weight, bias)
    out = jax.block_until_ready(out)

    # Reference check in plain JAX.
    ref = jax.nn.softmax(x @ weight.T + bias, axis=-1)
    assert out.shape == (batch, out_features)
    assert jnp.allclose(out, ref, atol=1e-5, rtol=1e-5)
    # Rows of a softmax sum to 1.
    assert jnp.allclose(jnp.sum(out, axis=-1), jnp.ones((batch,)), atol=1e-5)

    print("KERNEL_OK")
</pallas_src>

<mosaic_0001>
module attributes {stable_mosaic.version = 11 : i64} {
  func.func @_linear_softmax_kernel(%arg0: i32, %arg1: i32, %arg2: memref<8x32xf32, #tpu.memory_space<vmem>>, %arg3: memref<128x32xf32, #tpu.memory_space<vmem>>, %arg4: memref<1x128xf32, #tpu.memory_space<vmem>>, %arg5: memref<8x128xf32, #tpu.memory_space<vmem>>, %arg6: memref<8x128xf32, #tpu.memory_space<vmem>>) attributes {dimension_semantics = [#tpu.dimension_semantics<parallel>, #tpu.dimension_semantics<arbitrary>], iteration_bounds = array<i64: 1, 1>, scalar_prefetch = 0 : i64, scratch_operands = 1 : i64, tpu.core_type = #tpu.core_type<tc>, window_params = [{transform_indices = @transform_0, window_bounds = array<i64: 8, 32>}, {transform_indices = @transform_1, window_bounds = array<i64: 128, 32>}, {pipeline_mode = #tpu.pipeline_mode<synchronous>, transform_indices = @transform_2, window_bounds = array<i64: 1, 128>}, {transform_indices = @transform_3, window_bounds = array<i64: 8, 128>}]} {
    %c0_i32 = arith.constant 0 : i32
    %0 = arith.cmpi eq, %arg1, %c0_i32 : i32
    %1 = arith.extui %0 : i1 to i32
    %c0_i32_0 = arith.constant 0 : i32
    %2 = arith.cmpi ne, %1, %c0_i32_0 : i32
    scf.if %2 {
      %cst_10 = arith.constant 0.000000e+00 : f32
      %12 = vector.broadcast %cst_10 : f32 to vector<8x128xf32>
      %c0_11 = arith.constant 0 : index
      %c0_12 = arith.constant 0 : index
      %13 = vector.load %arg6[%c0_11, %c0_12] : memref<8x128xf32, #tpu.memory_space<vmem>>, vector<8x128xf32>
      tpu.vector_store %arg6[%c0_11, %c0_12], %12 {strides = array<i32>} : memref<8x128xf32, #tpu.memory_space<vmem>>, vector<8x128xf32>,
    } else {
    }
    %c0 = arith.constant 0 : index
    %c0_1 = arith.constant 0 : index
    %3 = vector.load %arg6[%c0, %c0_1] : memref<8x128xf32, #tpu.memory_space<vmem>>, vector<8x128xf32>
    %c0_2 = arith.constant 0 : index
    %c0_3 = arith.constant 0 : index
    %4 = vector.load %arg2[%c0_2, %c0_3] : memref<8x32xf32, #tpu.memory_space<vmem>>, vector<8x32xf32>
    %c0_4 = arith.constant 0 : index
    %c0_5 = arith.constant 0 : index
    %5 = vector.load %arg3[%c0_4, %c0_5] : memref<128x32xf32, #tpu.memory_space<vmem>>, vector<128x32xf32>
    %cst = arith.constant dense<0.000000e+00> : vector<8x128xf32>
    %6 = tpu.matmul %4, %5, %cst {dimension_numbers = #tpu.dot_dimension_numbers<[1], [1], [0], [0], [0, 0, 1, 0], [], []>} : vector<8x32xf32>, vector<128x32xf32>, vector<8x128xf32> -> vector<8x128xf32>
    %7 = arith.addf %3, %6 : vector<8x128xf32>
    %c0_6 = arith.constant 0 : index
    %c0_7 = arith.constant 0 : index
    %8 = vector.load %arg6[%c0_6, %c0_7] : memref<8x128xf32, #tpu.memory_space<vmem>>, vector<8x128xf32>
    tpu.vector_store %arg6[%c0_6, %c0_7], %7 {strides = array<i32>} : memref<8x128xf32, #tpu.memory_space<vmem>>, vector<8x128xf32>,
    %c0_i32_8 = arith.constant 0 : i32
    %9 = arith.cmpi eq, %arg1, %c0_i32_8 : i32
    %10 = arith.extui %9 : i1 to i32
    %c0_i32_9 = arith.constant 0 : i32
    %11 = arith.cmpi ne, %10, %c0_i32_9 : i32
    scf.if %11 {
      %c0_10 = arith.constant 0 : index
      %c0_11 = arith.constant 0 : index
      %12 = vector.load %arg6[%c0_10, %c0_11] : memref<8x128xf32, #tpu.memory_space<vmem>>, vector<8x128xf32>
      %c0_12 = arith.constant 0 : index
      %c0_13 = arith.constant 0 : index
      %13 = vector.load %arg4[%c0_12, %c0_13] : memref<1x128xf32, #tpu.memory_space<vmem>>, vector<1x128xf32>
      %14 = vector.broadcast %13 : vector<1x128xf32> to vector<8x128xf32>
      %15 = arith.addf %12, %14 : vector<8x128xf32>
      %cst_14 = arith.constant dense<0xFF800000> : vector<8xf32>
      %16 = vector.multi_reduction <maximumf>, %15, %cst_14 [1] : vector<8x128xf32> to vector<8xf32>
      %17 = vector.shape_cast %16 : vector<8xf32> to vector<8x1xf32>
      %18 = vector.broadcast %17 : vector<8x1xf32> to vector<8x128xf32>
      %19 = arith.subf %15, %18 : vector<8x128xf32>
      %20 = math.exp %19 : vector<8x128xf32>
      %cst_15 = arith.constant dense<0.000000e+00> : vector<8xf32>
      %21 = vector.multi_reduction <add>, %20, %cst_15 [1] : vector<8x128xf32> to vector<8xf32>
      %22 = vector.shape_cast %21 : vector<8xf32> to vector<8x1xf32>
      %23 = tpu.reciprocal %22 : vector<8x1xf32> -> vector<8x1xf32>
      %24 = vector.broadcast %23 : vector<8x1xf32> to vector<8x128xf32>
      %25 = arith.mulf %20, %24 : vector<8x128xf32>
      %c0_16 = arith.constant 0 : index
      %c0_17 = arith.constant 0 : index
      %26 = vector.load %arg5[%c0_16, %c0_17] : memref<8x128xf32, #tpu.memory_space<vmem>>, vector<8x128xf32>
      tpu.vector_store %arg5[%c0_16, %c0_17], %25 {strides = array<i32>} : memref<8x128xf32, #tpu.memory_space<vmem>>, vector<8x128xf32>,
    } else {
    }
    return
  }
  func.func @transform_0(%arg0: i32, %arg1: i32) -> (i32, i32) {
    %c0_i32 = arith.constant 0 : i32
    return %arg0, %arg1 : i32, i32
  }
  func.func @transform_1(%arg0: i32, %arg1: i32) -> (i32, i32) {
    %c0_i32 = arith.constant 0 : i32
    %c0_i32_0 = arith.constant 0 : i32
    return %c0_i32, %arg1 : i32, i32
  }
  func.func @transform_2(%arg0: i32, %arg1: i32) -> (i32, i32) {
    %c0_i32 = arith.constant 0 : i32
    %c0_i32_0 = arith.constant 0 : i32
    %c0_i32_1 = arith.constant 0 : i32
    return %c0_i32, %c0_i32_0 : i32, i32
  }
  func.func @transform_3(%arg0: i32, %arg1: i32) -> (i32, i32) {
    %c0_i32 = arith.constant 0 : i32
    %c0_i32_0 = arith.constant 0 : i32
    return %arg0, %c0_i32 : i32, i32
  }
}

</mosaic_0001>

<bundles_post_ra>
// kernel: linear_softmax.1
= control target key start
LH: loop header
LB: loop body
LE: loop exit
PB: predicated region body
PF: predicated region fallthrough
CT: control target
= control target key end

     0   :  { %vm38_vm0 = vcmask 261120   ;;  %v332_v2 = vmov 0.0|0.0   ;;  %vm333_vm2 = vmmov 0   ;;  %v334_v5 = vmov 0.0   ;;  %s445_s0 = inlined_call_operand.vmem [shape: f32[8,32], index: 0, kind: input, shape index: {}]   ;;  %s446_s1 = inlined_call_operand.vmem [shape: f32[128,32], index: 1, kind: input, shape index: {}]   ;;  %s447_s2 = inlined_call_operand.vmem [shape: f32[1,128], index: 2, kind: input, shape index: {}]   ;;  %s448_s3 = inlined_call_operand.hbm [shape: f32[8,128], index: 3, kind: output, shape index: {}]  }
   0x1   :  { %v22_v0 = vld [vmem:[%s446_s1] sm:$0xff]  ;;  %v23_v1 = vld [vmem:[%s446_s1 + $0x8] sm:$0xff]  ;;  %268 = vmatprep.subr.bf16.mxu0 %v332_v2  ;;  %vm364_vm1 = vmpackc.low %vm38_vm0, %vm38_vm0  ;;  %265 = vmatprep.mubr.msk.f32.mxu0 %vm333_vm2, %v334_v5 }
   0x2   :  { %v269_v3 = vpack.c.bf16 %v23_v1, %v22_v0  ;;  %v24_v6 = vld [vmem:[%s446_s1 + $0x10] sm:$0xff]  ;;  %v25_v7 = vld [vmem:[%s446_s1 + $0x18] sm:$0xff] }
   0x4   :  { %271 = vmatpush3.bf16.xpose.msk.msra.mxu0 %vm364_vm1, %v269_v3 }
   0x5   :  { %272 = vmatprep.subr.bf16.mxu0 %v332_v2 }
   0x6   :  { %8 = vsyncpa [#allocation4], 0  ;;  %v273_v8 = vpack.c.bf16 %v25_v7, %v24_v6  ;;  %v26_v9 = vld [vmem:[%s446_s1 + $0x20] sm:$0xff]  ;;  %v27_v10 = vld [vmem:[%s446_s1 + $0x28] sm:$0xff] }
   0x7   :  { %v277_v11 = vpack.c.bf16 %v27_v10, %v26_v9  ;;  %v28_v12 = vld [vmem:[%s446_s1 + $0x30] sm:$0xff]  ;;  %v29_v13 = vld [vmem:[%s446_s1 + $0x38] sm:$0xff]  ;;  %v30_v15 = vld [vmem:[%s446_s1 + $0x40] sm:$0xff] }
   0x8   :  { %v281_v14 = vpack.c.bf16 %v29_v13, %v28_v12  ;;  %v31_v16 = vld [vmem:[%s446_s1 + $0x48] sm:$0xff]  ;;  %v32_v18 = vld [vmem:[%s446_s1 + $0x50] sm:$0xff]  ;;  %v33_v19 = vld [vmem:[%s446_s1 + $0x58] sm:$0xff] }
   0x9   :  { %v285_v17 = vpack.c.bf16 %v31_v16, %v30_v15  ;;  %v289_v20 = vpack.c.bf16 %v33_v19, %v32_v18  ;;  %v34_v21 = vld [vmem:[%s446_s1 + $0x60] sm:$0xff]  ;;  %v35_v22 = vld [vmem:[%s446_s1 + $0x68] sm:$0xff]  ;;  %v36_v24 = vld [vmem:[%s446_s1 + $0x70] sm:$0xff] }
   0xa   :  { %v293_v23 = vpack.c.bf16 %v35_v22, %v34_v21  ;;  %v37_v25 = vld [vmem:[%s446_s1 + $0x78] sm:$0xff]  ;;  %v21_v27 = vld [vmem:[%s445_s0] sm:$0xff]  ;;  %s335_s1 = smov [#allocation3]  }
   0xb   :  { %v297_v26 = vpack.c.bf16 %v37_v25, %v36_v24  ;;  %v215_v28 = vld [vmem:[%s447_s2] ss:$0 sm:$0xff]  ;;  %s190_s0 = sshll.u32 %s335_s1, 4  ;;  %s191_s0 = int_to_ptr.vmem [resolvable:$true] %s190_s0 }
   0xc   :  { %275 = vmatpush3.bf16.xpose.msk.msra.mxu0 %vm364_vm1, %v273_v8  ;;  %s308_s21 = scalar_lea.vmem %s191_s0, 128  ;;  %p313_p1 = scmp.lt.s32.totalorder %s191_s0, %s191_s0 }
   0xd   :  { %276 = vmatprep.subr.bf16.mxu0 %v332_v2  ;;  %p309_p0 = scmp.ne.s32.totalorder %s191_s0, %s308_s21  ;;  %p314_p2 = scmp.lt.s32.totalorder %s308_s21, %s308_s21 }
   0xf   :  { %p315_p3 = por %p314_p2, %p313_p1 }
  0x11   :  { %p316_p4 = pnand %p315_p3, %p309_p0 }
  0x14   :  { %279 = vmatpush3.bf16.xpose.msk.msra.mxu0 %vm364_vm1, %v277_v11 }
  0x15   :  { %280 = vmatprep.subr.bf16.mxu0 %v332_v2 }
  0x1c   :  { %283 = vmatpush3.bf16.xpose.msk.msra.mxu0 %vm364_vm1, %v281_v14 }
  0x1d   :  { %284 = vmatprep.subr.bf16.mxu0 %v332_v2 }
  0x24   :  { %287 = vmatpush3.bf16.xpose.msk.msra.mxu0 %vm364_vm1, %v285_v17 }
  0x25   :  { %288 = vmatprep.subr.bf16.mxu0 %v332_v2 }
  0x2c   :  { %291 = vmatpush3.bf16.xpose.msk.msra.mxu0 %vm364_vm1, %v289_v20 }
  0x2d   :  { %292 = vmatprep.subr.bf16.mxu0 %v332_v2 }
  0x34   :  { %295 = vmatpush3.bf16.xpose.msk.msra.mxu0 %vm364_vm1, %v293_v23 }
  0x35   :  { %296 = vmatprep.subr.bf16.mxu0 %v332_v2 }
  0x3c   :  { %299 = vmatpush3.bf16.xpose.msk.msra.mxu0 %vm364_vm1, %v297_v26 }
  0x43   :  { %266 = vmatmul.mubr.msk.f32.vlgmr.msra.gmra.mrb[0].mxu0 %vm38_vm0, %v21_v27 }
 0x116   :  { %v156_v29 = vpop.f32.mrb[0].mxu0 }
 0x117   :  { %v173_v30 = vadd.f32 %v215_v28, %v156_v29  ;;  %v267_v31 = vpop.f32.mrb[1].mxu0 }
 0x119   :  { %174 = vmax.xlane.f32.xlu0 %v173_v30 }
 0x1a6   :  { %v175_v32 = vpop.xlane.xlu0 %174 }
 0x1a7   :  { %v176_v33 = vsub.f32 %v173_v30, %v175_v32 }
 0x1a9   :  { %v177_v34 = vmul.f32 1.442695, %v176_v33 }
 0x1ab   :  { %304 = vpow2.f32 %v177_v34 }
 0x1b5   :  { %v305_v35 = vpop.eup %304 }
 0x1b6   :  { %179 = vadd.xlane.f32.xlu0 %v305_v35 }
 0x243   :  { %v180_v36 = vpop.xlane.xlu0 %179 }
 0x244   :  { %306 = vrcp.f32 %v180_v36 }
 0x24e   :  { %v307_v37 = vpop.eup %306 }
 0x24f   :  { %v182_v38 = vmul.f32 %v307_v37, %v305_v35 }
 0x251   :  { %183 = vst [vmem:[#allocation3] sm:$0xff] %v182_v38 }
 0x252   :  { %319 = shalt.err (!%p316_p4)
}
 0x253   :  { %s320_s23 = scalar_lea.hbm %s448_s3, 128 }
 0x254   :  { %p321_p5 = scmp.ne.s32.totalorder %s448_s3, %s320_s23  ;;  %p324_p6 = scmp.lt.u32.totalorder %s320_s23, %s448_s3 }
 0x256   :  { %p326_p7 = pnand %p324_p6, %p321_p5 }
 0x258   :  { %329 = shalt.err (!%p326_p7)
}
 0x259   :  { %193 = dma.vmem_to_hbm [thread:$0]  %s191_s0, 128, %s448_s3, [#allocation4]  }
 0x25a   :  { %330 = dma.done.wait [#allocation4], 128  }
 0x25b   :  { %331 = vsyncadd [#allocation4], 4294967168 }
 0x25c   :  { %197 = vsyncpa [#allocation4], 1 }

</bundles_post_ra>
